<compile_context>
chip_gen: v7x
topology: tpu7x:2x2x1
jax: 0.10.0
libtpu: 0.0.40
codegen_flags: <defaults>
</compile_context>

<pallas_src>
import jax
import jax.numpy as jnp
from jax.experimental import pallas as pl
from jax.experimental.pallas import tpu as pltpu


def noise_injection_kernel(w_ref, img_ref, noise_ref, out_ref):
    """out = image + weight * noise, noise broadcast over the channel axis.

    w_ref     : (1,) scalar-prefetch ref in SMEM (the nn.Parameter)
    img_ref   : (1, C, T) VMEM tile
    noise_ref : (1, 1, T) VMEM tile (broadcast over C inside the kernel)
    out_ref   : (1, C, T) VMEM tile
    """
    w = w_ref[0]
    # Compute in f32 (weight dtype promotes), then cast back so bf16 stays bf16.
    out_ref[...] = (img_ref[...] + w * noise_ref[...]).astype(out_ref.dtype)


_VMEM_LIMIT_BYTES = 32 << 20   # scoped-VMEM budget (safe on v5e/v6e/v7x)
_BLOCK_TARGET_BYTES = 4 << 20  # target size of one (1, C, T) image block


def _pick_tile(hw, c, itemsize, target_bytes=_BLOCK_TARGET_BYTES):
    """Largest multiple-of-128 tile T dividing hw with C*T*itemsize <= target.

    Steady-state VMEM footprint with double buffering is roughly
    2 * (img_block + out_block + noise_block) ~= 4 * target + eps, which is
    well inside the 32 MiB scoped-VMEM budget requested below.
    """
    if hw % 128 != 0:
        # Last block dim must be a multiple of 128 OR the full array extent.
        # Odd spatial sizes are tiny for this module, so full extent is fine.
        return hw
    max_t = max(128, (target_bytes // max(1, c * itemsize)) // 128 * 128)
    t = min(hw, max_t)
    while hw % t != 0:
        t -= 128
    return t


def noise_injection(image, weight, noise=None, *, key=None):
    """Pallas port of NoiseInjection.forward.

    image : (B, C, H, W)
    weight: (1,) parameter (torch: nn.Parameter(torch.zeros(1)))
    noise : (B, 1, H, W) or None (None -> standard-normal noise, like .normal_())
    """
    B, C, H, W = image.shape
    if noise is None:
        # TODO(synk): generate noise in-kernel via pltpu.prng_seed /
        # pltpu.prng_random_bits to skip one HBM write+read of the noise plane.
        if key is None:
            key = jax.random.PRNGKey(0)
        noise = jax.random.normal(key, (B, 1, H, W), dtype=image.dtype)

    HW = H * W
    # Free reshape for contiguous NCHW: long last (lane) axis -> dense stores.
    img2 = image.reshape(B, C, HW)
    noi2 = noise.reshape(B, 1, HW)
    w = jnp.asarray(weight, dtype=jnp.float32).reshape((1,))

    T = _pick_tile(HW, C, jnp.dtype(image.dtype).itemsize)
    grid = (B, HW // T)

    out = pl.pallas_call(
        noise_injection_kernel,
        out_shape=jax.ShapeDtypeStruct((B, C, HW), image.dtype),
        grid_spec=pltpu.PrefetchScalarGridSpec(
            num_scalar_prefetch=1,  # weight -> SMEM, passed first to the kernel
            grid=grid,
            in_specs=[
                # image tile: all channels of one (batch, spatial-tile)
                pl.BlockSpec((1, C, T), lambda b, t, w: (b, 0, t)),
                # noise tile: fetched once per (batch, spatial-tile); broadcast
                # over C in-kernel -> no Cx redundant noise traffic
                pl.BlockSpec((1, 1, T), lambda b, t, w: (b, 0, t)),
            ],
            out_specs=pl.BlockSpec((1, C, T), lambda b, t, w: (b, 0, t)),
        ),
        compiler_params=pltpu.CompilerParams(
            dimension_semantics=("parallel", "parallel"),
            vmem_limit_bytes=_VMEM_LIMIT_BYTES,
        ),
    )(w, img2, noi2)
    return out.reshape(B, C, H, W)


if __name__ == "__main__":
    key = jax.random.PRNGKey(0)
    k_img, k_noise = jax.random.split(key)

    B, C, H, W = 2, 4, 16, 16
    image = jax.random.normal(k_img, (B, C, H, W), dtype=jnp.float32)

    # Parameter from __init__: nn.Parameter(torch.zeros(1)) -> shape (1,).
    # Use a deterministic nonzero value so the multiply path is exercised.
    weight = jnp.array([0.1], dtype=jnp.float32)

    # Explicit-noise path (deterministic), matches PyTorch (B,C,H,W)+(B,1,H,W).
    noise = jax.random.normal(k_noise, (B, 1, H, W), dtype=jnp.float32)
    out = jax.block_until_ready(noise_injection(image, weight, noise))
    ref = image + weight[0] * noise
    assert out.shape == (B, C, H, W)
    assert jnp.allclose(out, ref, atol=1e-6), "mismatch vs reference"

    # noise=None path (noise generated in-wrapper); weight=0 -> identity,
    # which is the module's initialization state.
    zero_w = jnp.zeros((1,), dtype=jnp.float32)
    out2 = jax.block_until_ready(noise_injection(image, zero_w, key=k_noise))
    assert jnp.allclose(out2, image, atol=1e-6), "weight=0 should be identity"

    # Non-128-aligned spatial size exercises the full-extent-block fallback.
    image3 = jax.random.normal(k_img, (2, 3, 5, 7), dtype=jnp.float32)
    noise3 = jax.random.normal(k_noise, (2, 1, 5, 7), dtype=jnp.float32)
    out3 = jax.block_until_ready(noise_injection(image3, weight, noise3))
    ref3 = image3 + weight[0] * noise3
    assert jnp.allclose(out3, ref3, atol=1e-6), "mismatch on odd spatial shape"

    # bf16 path: kernel computes in f32 (weight promotes) and casts back.
    image4 = image.astype(jnp.bfloat16)
    noise4 = noise.astype(jnp.bfloat16)
    out4 = jax.block_until_ready(noise_injection(image4, weight, noise4))
    ref4 = (image4.astype(jnp.float32) + weight[0] * noise4.astype(jnp.float32))
    assert out4.dtype == jnp.bfloat16
    assert jnp.allclose(out4.astype(jnp.float32), ref4, atol=1e-2), "bf16 mismatch"

    print("KERNEL_OK")
</pallas_src>

<mosaic_0001>
module attributes {stable_mosaic.version = 11 : i64} {
  func.func @noise_injection_kernel(%arg0: i32, %arg1: i32, %arg2: memref<1xf32, #tpu.memory_space<smem>>, %arg3: memref<1x4x256xf32, #tpu.memory_space<vmem>>, %arg4: memref<1x1x256xf32, #tpu.memory_space<vmem>>, %arg5: memref<1x4x256xf32, #tpu.memory_space<vmem>>) attributes {dimension_semantics = [#tpu.dimension_semantics<parallel>, #tpu.dimension_semantics<parallel>], iteration_bounds = array<i64: 2, 1>, scalar_prefetch = 1 : i64, scratch_operands = 0 : i64, tpu.core_type = #tpu.core_type<tc>, window_params = [{transform_indices = @transform_0, window_bounds = array<i64: 1, 4, 256>}, {transform_indices = @transform_1, window_bounds = array<i64: 1, 1, 256>}, {transform_indices = @transform_2, window_bounds = array<i64: 1, 4, 256>}]} {
    %c0 = arith.constant 0 : index
    %0 = memref.load %arg2[%c0] : memref<1xf32, #tpu.memory_space<smem>>
    %c0_0 = arith.constant 0 : index
    %c0_1 = arith.constant 0 : index
    %c0_2 = arith.constant 0 : index
    %1 = vector.load %arg3[%c0_0, %c0_1, %c0_2] : memref<1x4x256xf32, #tpu.memory_space<vmem>>, vector<1x4x256xf32>
    %c0_3 = arith.constant 0 : index
    %c0_4 = arith.constant 0 : index
    %c0_5 = arith.constant 0 : index
    %2 = vector.load %arg4[%c0_3, %c0_4, %c0_5] : memref<1x1x256xf32, #tpu.memory_space<vmem>>, vector<1x1x256xf32>
    %3 = vector.broadcast %0 : f32 to vector<1x1x256xf32>
    %4 = arith.mulf %3, %2 : vector<1x1x256xf32>
    %5 = vector.broadcast %4 : vector<1x1x256xf32> to vector<1x4x256xf32>
    %6 = arith.addf %1, %5 : vector<1x4x256xf32>
    %c0_6 = arith.constant 0 : index
    %c0_7 = arith.constant 0 : index
    %c0_8 = arith.constant 0 : index
    %7 = vector.load %arg5[%c0_6, %c0_7, %c0_8] : memref<1x4x256xf32, #tpu.memory_space<vmem>>, vector<1x4x256xf32>
    tpu.vector_store %arg5[%c0_6, %c0_7, %c0_8], %6 {strides = array<i32>} : memref<1x4x256xf32, #tpu.memory_space<vmem>>, vector<1x4x256xf32>,
    return
  }
  func.func @transform_0(%arg0: i32, %arg1: i32, %arg2: memref<1xf32, #tpu.memory_space<smem>>) -> (i32, i32, i32) {
    %c0_i32 = arith.constant 0 : i32
    %c0_i32_0 = arith.constant 0 : i32
    return %arg0, %c0_i32, %arg1 : i32, i32, i32
  }
  func.func @transform_1(%arg0: i32, %arg1: i32, %arg2: memref<1xf32, #tpu.memory_space<smem>>) -> (i32, i32, i32) {
    %c0_i32 = arith.constant 0 : i32
    %c0_i32_0 = arith.constant 0 : i32
    return %arg0, %c0_i32, %arg1 : i32, i32, i32
  }
  func.func @transform_2(%arg0: i32, %arg1: i32, %arg2: memref<1xf32, #tpu.memory_space<smem>>) -> (i32, i32, i32) {
    %c0_i32 = arith.constant 0 : i32
    %c0_i32_0 = arith.constant 0 : i32
    return %arg0, %c0_i32, %arg1 : i32, i32, i32
  }
}

</mosaic_0001>

<bundles_post_ra>
// kernel: tpu_custom_call.1
= control target key start
LH: loop header
LB: loop body
LE: loop exit
PB: predicated region body
PF: predicated region fallthrough
CT: control target
= control target key end

     0   :  { %s745_s0 = inlined_call_operand.<no memory space> [shape: f32[1], index: 0, kind: input, shape index: {}]   ;;  %s746_s1 = inlined_call_operand.hbm [shape: f32[2,4,256], index: 1, kind: input, shape index: {}]   ;;  %s747_s2 = inlined_call_operand.vmem [shape: f32[2,1,256], index: 2, kind: input, shape index: {}]   ;;  %s748_s3 = inlined_call_operand.hbm [shape: f32[2,4,256], index: 3, kind: output, shape index: {}]  }
   0x1   :  { %8 = sst [smem:[#allocation3]] %s745_s0 }
   0x2   :  { %9 = vsyncpa [#allocation5], 0 }
   0x3   :  { %11 = vsyncpa [#allocation5 + $0x1], 0 }
   0x4   :  { %12 = vsyncpa [#allocation6], 0 }
   0x5   :  { %14 = vsyncpa [#allocation6 + $0x1], 0  ;;  %s568_s14 = smov 0   ;;  %s570_s15 = smov 0  }
   0x6   :  { %s572_s16 = smov 0   ;;  %s574_s17 = smov 0  }
   0x7   :  { %s576_s18 = smov 0   ;;  %s578_s19 = smov 0  }
   0x8 LB: > { %s349_s0 = sadd.s32 4294967295, %s541_s19   ;;  %s350_s20 = sadd.s32 4294967294, %s541_s19   ;;  %s541_s19 = sphi %s578_s19, %s20_s19   ;;  %s537_s18 = sphi %s576_s18, %s764_s18   ;;  %s533_s17 = sphi %s574_s17, %s763_s17   ;;  %s529_s16 = sphi %s572_s16, %s762_s16   ;;  %s525_s15 = sphi %s570_s15, %s761_s15   ;;  %s521_s14 = sphi %s568_s14, %s760_s14  }
   0x9   : > { %s32_s21 = sadd.s32 1, %s537_s18  ;;  %s41_s22 = sadd.s32 1, %s529_s16 }
   0xa   : > { %p34_p0 = scmp.ge.s32.totalorder %s32_s21, 2  ;;  %p48_p1 = scmp.ne.s32.totalorder %s529_s16, %s525_s15 }
   0xb   : > { %p49_p2 = scmp.eq.s32.totalorder %s541_s19, 0  ;;  %p54_p3 = scmp.ne.s32.totalorder %s525_s15, %s521_s14 }
   0xc   : > { %s766_s21 = smov (%p34_p0, %s32_s21), 0  ;;  %p55_p5 = scmp.eq.s32.totalorder %s349_s0, 0 }
   0xd   : > { %p609_p4 = por %p49_p2, %p48_p1  ;;  %s36_s24 = ssub.s32 %s537_s18, %s766_s21 }
   0xe   : > { %p108_p6 = scmp.eq.s32.totalorder %s349_s0, 1  ;;  %p39_p7 = scmp.eq.s32.totalorder %s36_s24, 0 }
   0xf   : > { %p615_p8 = por %p55_p5, %p54_p3  ;;  %p114_p10 = scmp.eq.s32.totalorder %s350_s20, 1 }
  0x10   : > { %p619_p9 = por %p108_p6, %p48_p1  ;;  %p379_p13 = scmp.lt.s32.totalorder %s541_s19, 2 }
  0x11   : > { %s624_s27 = scalar_select %p39_p7, %s529_s16, %s41_s22  }
  0x12   : > { %s752_s26 = scalar_select %p619_p9, 1, 0 }
  0x13   : > { %p626_p11 = por %p114_p10, %p54_p3  ;;  %s134_s29 = sand.u32 1, %s529_s16  }
  0x14   : > { %s353_s30 = sshll.u32 %s134_s29, 3  ;;  %s365_s4 = sshll.u32 %s537_s18, 7 }
  0x15   : > { %s753_s28 = scalar_select %p626_p11, 1, 0 }
  0x16   : > { %s637_s7 = scalar_lea.hbm %s746_s1, %s365_s4  ;;  %s138_s8 = scalar_lea.vmem [#allocation4], %s353_s30 }
  0x17   : > { %s148_s9 = sshll.u32 %s138_s8, 4  ;;  %p643_p0 = pnand %p379_p13, %p609_p4  ;;  %s639_s9 = int_to_ptr.vmem [resolvable:$true] %s148_s9 }
  0x18   : > { %s135_s11 = scalar_lea.sflag [#allocation5], %s134_s29  ;;  %s429_s12 = scalar_lea.hbm %s637_s7, 128 }
  0x19   : > { %p430_p3 = scmp.ne.s32.totalorder %s637_s7, %s429_s12  ;;  %p431_p5 = pneg %p643_p0 }
  0x1a   : > { %s434_s20 = scalar_lea.hbm %s746_s1, 256  ;;  %p435_p4 = scmp.lt.u32.totalorder %s637_s7, %s746_s1 }
  0x1b   : > { %p432_p6 = pnand %p431_p5, %p430_p3  ;;  %p436_p10 = scmp.lt.u32.totalorder %s434_s20, %s429_s12 }
  0x1c   : > { %p438_p12 = scmp.lt.u32.totalorder %s429_s12, %s637_s7 }
  0x1d   : > { %p433_p7 = pneg %p432_p6  ;;  %p437_p13 = por %p436_p10, %p435_p4 }
  0x1f   : > { %p439_p1 = por %p438_p12, %p437_p13 }
  0x21   : > { %p440_p2 = pnand %p439_p1, %p433_p7 }
  0x23   : > { %443 = shalt.err (!%p440_p2)
}
  0x24   : > { %s444_s24 = scalar_lea.vmem %s639_s9, 128  ;;  %s543_s29 = smov [#allocation4]  }
  0x25   : > { %p445_p3 = scmp.ne.s32.totalorder %s639_s9, %s444_s24  ;;  %s449_s30 = sshll.u32 %s543_s29, 4  ;;  %s450_s30 = int_to_ptr.vmem [resolvable:$false] %s449_s30 }
  0x26   : > { %s451_s4 = scalar_lea.vmem %s450_s30, 256  ;;  %p452_p9 = scmp.lt.s32.totalorder %s639_s9, %s450_s30 }
  0x27   : > { %p447_p6 = pnand %p445_p3, %p431_p5  ;;  %p453_p4 = scmp.lt.s32.totalorder %s451_s4, %s444_s24 }
  0x29   : > { %p448_p11 = pneg %p447_p6  ;;  %p454_p10 = por %p453_p4, %p452_p9 }
  0x2b   : > { %p455_p12 = pnand %p454_p10, %p448_p11 }
  0x2d   : > { %458 = shalt.err (!%p455_p12)
}
  0x2e   : > { %374 = dma.hbm_to_vmem [thread:$0]  (!%p643_p0), %s637_s7, 128, %s639_s9, %s135_s11  }
  0x2f   : > { %p755_p1 = scmp.lt.s32.totalorder %s541_s19, 3  ;;  %p756_p2 = scmp.ge.s32.totalorder %s541_s19, 1 }
  0x31   : > { %p166_p5 = pnand %p756_p2, %p755_p1 }
  0x32   : > { %s679_s5 = sand.u32 (!%p166_p5), 1, %s525_s15  }
  0x33   : > { %169 = sbr.rel (%p166_p5) target bundleno = 88 (0x58), region = 28  ;;  %s357_s6 = sshll.u32 (!%p166_p5), %s679_s5, 3 }
  0x34   : > { %s172_s8 = scalar_lea.sflag (!%p166_p5), [#allocation5], %s679_s5  ;;  %s175_s12 = scalar_lea.vmem (!%p166_p5), [#allocation4], %s357_s6 }
  0x3a   : > { %512 = dma.done.wait (%p615_p8), %s172_s8, 128  }
  0x3b   : > { %514 = vsyncadd (%p615_p8), %s172_s8, 4294967168  ;;  %p206_p9 = scmp.lt.s32.totalorder %s533_s17, 1  ;;  %v221_v0 = vlaneseq  ;;  %s215_s7 = sld [smem:[#allocation3]]  ;;  %v216_v9 = vld [vmem:[%s175_s12] sm:$0xff] }
  0x3c   : > { %s203_s25 = scalar_lea.vmem [#allocation7], %s357_s6  ;;  %s366_s22 = sshll.u32 %s533_s17, 7 }
  0x3d   : > { %s207_s9 = scalar_select %p206_p9, %s533_s17, 1  ;;  %v222_v1 = vshrl.u32 %v221_v0, 7 }
  0x3e   : > { %s250_s20 = sshll.u32 %s203_s25, 4  ;;  %s698_s29 = scalar_lea.hbm %s748_s3, %s366_s22  ;;  %s693_s20 = int_to_ptr.vmem [resolvable:$true] %s250_s20 }
  0x3f   : > { %s359_s10 = sshll.u32 %s207_s9, 1  ;;  %v223_v2 = vsub.s32 0, %v222_v1  ;;  %v227_v3 = vsub.s32 1, %v222_v1  ;;  %s234_s30 = scalar_lea.sflag [#allocation6], %s679_s5 }
  0x40   : > { %s212_s0 = scalar_lea.vmem %s747_s2, %s359_s10  ;;  %s459_s4 = scalar_lea.vmem %s693_s20, 128 }
  0x41   : > { %v217_v4 = vld [vmem:[%s212_s0] sm:$0x3]  ;;  %v218_v5 = vstv %s215_s7  ;;  %p460_p8 = scmp.ne.s32.totalorder %s693_s20, %s459_s4  ;;  %p757_p11 = scmp.ne.s32.totalorder %s752_s26, 0 }
  0x42   : > { %v219_v6 = vmul.f32 %v218_v5, %v217_v4  ;;  %s544_s17 = smov [#allocation7]  }
  0x43   : > { %p461_p0 = pnand %p460_p8, %p757_p11  ;;  %s463_s6 = sshll.u32 %s544_s17, 4  ;;  %s464_s6 = int_to_ptr.vmem [resolvable:$false] %s463_s6 }
  0x44   : > { %v224_v7 = vrot.slane %v219_v6, %v223_v2  ;;  %v228_v8 = vrot.slane %v219_v6, %v227_v3  ;;  %s465_s8 = scalar_lea.vmem %s464_s6, 256  ;;  %p466_p13 = scmp.lt.s32.totalorder %s693_s20, %s464_s6 }
  0x45   : > { %p462_p7 = pneg %p461_p0  ;;  %p467_p3 = scmp.lt.s32.totalorder %s465_s8, %s459_s4 }
  0x46   : > { %v229_v10 = vcombine.low %v224_v7, %v228_v8 }
  0x47   : > { %p468_p6 = por %p467_p3, %p466_p13 }
  0x48   : > { %v231_v11 = vadd.f32 %v229_v10, %v216_v9 }
  0x49   : > { %p469_p4 = pnand %p468_p6, %p462_p7 }
  0x4a   : > { %232 = vst [vmem:[%s203_s25] sm:$0xff] %v231_v11 }
  0x4b   : > { %472 = shalt.err (!%p469_p4)
}
  0x4c   : > { %s473_s5 = scalar_lea.hbm %s698_s29, 128  ;;  %s477_s9 = scalar_lea.hbm %s748_s3, 256 }
  0x4d   : > { %p474_p10 = scmp.ne.s32.totalorder %s698_s29, %s473_s5  ;;  %p478_p2 = scmp.lt.u32.totalorder %s698_s29, %s748_s3 }
  0x4e   : > { %p479_p5 = scmp.lt.u32.totalorder %s477_s9, %s473_s5  ;;  %p481_p8 = scmp.lt.u32.totalorder %s473_s5, %s698_s29 }
  0x4f   : > { %p475_p12 = pnand %p474_p10, %p757_p11 }
  0x50   : > { %p480_p9 = por %p479_p5, %p478_p2 }
  0x51   : > { %p476_p1 = pneg %p475_p12 }
  0x52   : > { %p482_p0 = por %p481_p8, %p480_p9 }
  0x54   : > { %p483_p7 = pnand %p482_p0, %p476_p1 }
  0x56   : > { %486 = shalt.err (!%p483_p7)
}
  0x57   : > { %369 = dma.vmem_to_hbm [thread:$0]  (%p757_p11), %s693_s20, 128, %s698_s29, %s234_s30  }
  0x58 PF: > { %s262_s13 = sand.u32 1, %s521_s14   ;;  %p758_p13 = scmp.ne.s32.totalorder %s753_s28, 0 }
  0x59   : > { %p759_p3 = scmp.ge.s32.totalorder %s541_s19, 2  ;;  %s263_s0 = scalar_lea.sflag [#allocation6], %s262_s13 }
  0x5b   : > { %p376_p6 = pnand %p759_p3, %p758_p13 }
  0x5d   : > { %516 = dma.done.wait (!%p376_p6), %s263_s0, 128  }
  0x5e   : > { %518 = vsyncadd (!%p376_p6), %s263_s0, 4294967168  ;;  %s20_s19 = sadd.s32 1, %s541_s19   ;;  %s760_s14 = smov %s525_s15 }
  0x5f   : > { %p17_p4 = scmp.ge.s32.totalorder %s20_s19, 4   ;;  %s761_s15 = smov %s529_s16 }
  0x60   : > { %s762_s16 = smov %s624_s27  ;;  %s763_s17 = smov %s537_s18 }
  0x61   : > { %s764_s18 = smov %s766_s21  ;;  %19 = sbr.rel (!%p17_p4) target bundleno = 8 (0x8), region = 76 }
  0x68   :  { %268 = vsyncpa [#allocation5], 1 }
  0x69   :  { %270 = vsyncpa [#allocation5 + $0x1], 1 }
  0x6a   :  { %271 = vsyncpa [#allocation6], 1 }
  0x6b   :  { %273 = vsyncpa [#allocation6 + $0x1], 1 }

</bundles_post_ra>
